<compile_context>
chip_gen: v6e
topology: v6e:2x2x1
jax: 0.10.0
libtpu: 0.0.40
codegen_flags: <defaults>
</compile_context>

<pallas_src>
import functools

import jax
import jax.numpy as jnp
from jax.experimental import pallas as pl
from jax.experimental.pallas import tpu as pltpu

_LANES = 128
_MAX_TILE_ROWS = 1024  # 1024 * 128 * 4 B = 512 KiB per tile buffer


def _rosenbrock_tile_kernel(nxt_ref, dpb_ref, x_ref, grad_ref, objp_ref, *, n):
    """One (tile_rows, 128) tile of the chained-Rosenbrock objective + grad."""
    g = pl.program_id(0)
    x = x_ref[...]                                   # (TR, 128) f32, dense
    tr, lanes = x.shape

    row = jax.lax.broadcasted_iota(jnp.int32, x.shape, 0)
    lane = jax.lax.broadcasted_iota(jnp.int32, x.shape, 1)
    idx = (g * tr + row) * lanes + lane              # global flat element index

    x_after = nxt_ref[g]     # scalar: x[first element of the next tile]
    d_before = dpb_ref[g]    # scalar: d at the element just before this tile

    # x_next[i] = x[i+1]: lane-roll (non-negative shift), sublane-roll for the
    # lane-127 column, SMEM scalar for the tile's very last element.
    ln = pltpu.roll(x, shift=lanes - 1, axis=1)              # x[r, (c+1)%128]
    sub = pltpu.roll(ln, shift=tr - 1, axis=0) if tr > 1 else ln
    x_next = jnp.where(lane == lanes - 1,
                       jnp.where(row == tr - 1, x_after, sub),
                       ln)

    one_minus = 1.0 - x
    d = x_next - x * x                               # x[i+1] - x[i]^2

    not_last = idx < (n - 1)                         # masks wrap/pad junk
    not_first = idx > 0

    # Objective: per-tile lane-wise partial sums (reduced in the wrapper).
    term = jnp.where(not_last, 100.0 * d * d + one_minus * one_minus, 0.0)
    objp_ref[...] = jnp.sum(term, axis=0, keepdims=True).reshape(1, 1, lanes)

    # d_prev[i] = d[i-1]: reuse d via rolls instead of recomputing x_prev.
    ld = pltpu.roll(d, shift=1, axis=1)
    subd = pltpu.roll(ld, shift=1, axis=0) if tr > 1 else ld
    d_prev = jnp.where(lane == 0,
                       jnp.where(row == 0, d_before, subd),
                       ld)

    # grad[i] = [i<n-1] * (-400*x[i]*d[i] - 2*(1-x[i])) + [i>0] * 200*d_prev[i]
    grad = jnp.where(not_last, -400.0 * x * d - 2.0 * one_minus, 0.0)
    grad = grad + jnp.where(not_first, 200.0 * d_prev, 0.0)
    grad_ref[...] = grad                             # one lane-dense store


@functools.partial(jax.jit, static_argnames=("tile_rows",))
def cutest_forward(x, tile_rows=None):
    """x: (N,) f32 parameter vector -> (objective scalar f32, grad (N,) f32)."""
    n = int(x.shape[0])
    x = x.astype(jnp.float32)

    if tile_rows is None:
        rows_needed = -(-n // _LANES)
        tile_rows = min(_MAX_TILE_ROWS, ((rows_needed + 7) // 8) * 8)
    if tile_rows % 8 != 0:
        raise ValueError("tile_rows must be a multiple of 8 sublanes")

    chunk = tile_rows * _LANES                  # elements per tile
    n_pad = -(-n // chunk) * chunk              # pad so every tile is full
    num_rows = n_pad // _LANES
    num_tiles = num_rows // tile_rows

    x_flat = jnp.pad(x, (0, n_pad - n))
    x2d = x_flat.reshape(num_rows, _LANES)      # dense (R, 128) packing

    # Per-tile cross-boundary scalars (live in SMEM inside the kernel).
    starts = jnp.arange(num_tiles, dtype=jnp.int32) * chunk
    nxt = x_flat[jnp.minimum(starts + chunk, n_pad - 1)]          # x[tile_end]
    x_prev_b = x_flat[jnp.maximum(starts - 1, 0)]
    dpb = x_flat[starts] - x_prev_b * x_prev_b                    # d[start-1]

    kernel = functools.partial(_rosenbrock_tile_kernel, n=n)

    grad2d, obj_partials = pl.pallas_call(
        kernel,
        grid=(num_tiles,),
        in_specs=[
            pl.BlockSpec(memory_space=pltpu.MemorySpace.SMEM),      # nxt (G,)
            pl.BlockSpec(memory_space=pltpu.MemorySpace.SMEM),      # dpb (G,)
            pl.BlockSpec((tile_rows, _LANES), lambda i: (i, 0)),    # x tile
        ],
        out_specs=(
            pl.BlockSpec((tile_rows, _LANES), lambda i: (i, 0)),    # grad tile
            pl.BlockSpec((1, 1, _LANES), lambda i: (i, 0, 0)),      # obj parts
        ),
        out_shape=(
            jax.ShapeDtypeStruct((num_rows, _LANES), jnp.float32),
            jax.ShapeDtypeStruct((num_tiles, 1, _LANES), jnp.float32),
        ),
        compiler_params=pltpu.CompilerParams(
            dimension_semantics=("parallel",)),
    )(nxt, dpb, x2d)

    obj = jnp.sum(obj_partials)
    grad = grad2d.reshape(-1)[:n]
    return obj, grad


def _reference(x):
    x = x.astype(jnp.float32)

    def f(v):
        return jnp.sum(100.0 * (v[1:] - v[:-1] ** 2) ** 2 + (1.0 - v[:-1]) ** 2)

    return f(x), jax.grad(f)(x)


if __name__ == "__main__":
    key = jax.random.PRNGKey(0)
    # Deterministic stand-ins for problem.x0: classic Rosenbrock start point
    # plus PRNGKey(0) noise.  Second case forces a multi-tile grid (G=2) so
    # the cross-tile boundary handling is exercised; third is not 128-aligned
    # and exercises the padding path.
    cases = [(2048, 8), (128, None), (300, None)]
    for n, tile_rows in cases:
        key, sub = jax.random.split(key)
        base = jnp.where(jnp.arange(n) % 2 == 0, -1.2, 1.0).astype(jnp.float32)
        x0 = base + 0.1 * jax.random.normal(sub, (n,), dtype=jnp.float32)

        obj, grad = cutest_forward(x0, tile_rows=tile_rows)
        obj = jax.block_until_ready(obj)
        grad = jax.block_until_ready(grad)

        obj_ref, grad_ref = _reference(x0)
        assert jnp.allclose(obj, obj_ref, rtol=1e-4, atol=1e-2), (
            n, float(obj), float(obj_ref))
        assert jnp.allclose(grad, grad_ref, rtol=1e-4, atol=1e-2), n

    # TODO(synk): the generic PyCUTEst problem.obj() black-box Fortran call has
    # no Pallas equivalent; a concrete CUTEst objective (chained Rosenbrock)
    # with its analytic gradient is implemented in-kernel instead.
    print("KERNEL_OK")
</pallas_src>

<mosaic_0001>
module attributes {stable_mosaic.version = 11 : i64} {
  func.func @_rosenbrock_tile_kernel(%arg0: i32, %arg1: memref<2xf32, #tpu.memory_space<smem>>, %arg2: memref<2xf32, #tpu.memory_space<smem>>, %arg3: memref<8x128xf32, #tpu.memory_space<vmem>>, %arg4: memref<8x128xf32, #tpu.memory_space<vmem>>, %arg5: memref<1x1x128xf32, #tpu.memory_space<vmem>>) attributes {dimension_semantics = [#tpu.dimension_semantics<parallel>], iteration_bounds = array<i64: 2>, scalar_prefetch = 0 : i64, scratch_operands = 0 : i64, tpu.core_type = #tpu.core_type<tc>, window_params = [{transform_indices = @transform_0, window_bounds = array<i64: 2>}, {transform_indices = @transform_1, window_bounds = array<i64: 2>}, {transform_indices = @transform_2, window_bounds = array<i64: 8, 128>}, {transform_indices = @transform_3, window_bounds = array<i64: 8, 128>}, {transform_indices = @transform_4, window_bounds = array<i64: 1, 1, 128>}]} {
    %c0 = arith.constant 0 : index
    %c0_0 = arith.constant 0 : index
    %0 = vector.load %arg3[%c0, %c0_0] : memref<8x128xf32, #tpu.memory_space<vmem>>, vector<8x128xf32>
    %1 = tpu.iota {dimensions = array<i32: 0>} : vector<8x128xi32>
    %2 = tpu.iota {dimensions = array<i32: 1>} : vector<8x128xi32>
    %c8_i32 = arith.constant 8 : i32
    %3 = arith.muli %arg0, %c8_i32 : i32
    %4 = vector.broadcast %3 : i32 to vector<8x128xi32>
    %5 = arith.addi %4, %1 : vector<8x128xi32>
    %c128_i32 = arith.constant 128 : i32
    %6 = vector.broadcast %c128_i32 : i32 to vector<8x128xi32>
    %7 = arith.muli %5, %6 : vector<8x128xi32>
    %8 = arith.addi %7, %2 : vector<8x128xi32>
    %9 = arith.index_cast %arg0 : i32 to index
    %10 = memref.load %arg1[%9] : memref<2xf32, #tpu.memory_space<smem>>
    %11 = arith.index_cast %arg0 : i32 to index
    %12 = memref.load %arg2[%11] : memref<2xf32, #tpu.memory_space<smem>>
    %c127_i32 = arith.constant 127 : i32
    %13 = tpu.dynamic_rotate %0 by %c127_i32 dim 1 : vector<8x128xf32>, i32 -> vector<8x128xf32>
    %c7_i32 = arith.constant 7 : i32
    %14 = tpu.dynamic_rotate %13 by %c7_i32 dim 0 : vector<8x128xf32>, i32 -> vector<8x128xf32>
    %c127_i32_1 = arith.constant 127 : i32
    %15 = vector.broadcast %c127_i32_1 : i32 to vector<8x128xi32>
    %16 = arith.cmpi eq, %2, %15 : vector<8x128xi32>
    %c7_i32_2 = arith.constant 7 : i32
    %17 = vector.broadcast %c7_i32_2 : i32 to vector<8x128xi32>
    %18 = arith.cmpi eq, %1, %17 : vector<8x128xi32>
    %19 = vector.broadcast %10 : f32 to vector<8x128xf32>
    %20 = arith.select %18, %19, %14 : vector<8x128xi1>, vector<8x128xf32>
    %21 = arith.select %16, %20, %13 : vector<8x128xi1>, vector<8x128xf32>
    %cst = arith.constant 1.000000e+00 : f32
    %22 = vector.broadcast %cst : f32 to vector<8x128xf32>
    %23 = arith.subf %22, %0 : vector<8x128xf32>
    %24 = arith.mulf %0, %0 : vector<8x128xf32>
    %25 = arith.subf %21, %24 : vector<8x128xf32>
    %c2047_i32 = arith.constant 2047 : i32
    %26 = vector.broadcast %c2047_i32 : i32 to vector<8x128xi32>
    %27 = arith.cmpi slt, %8, %26 : vector<8x128xi32>
    %c0_i32 = arith.constant 0 : i32
    %28 = vector.broadcast %c0_i32 : i32 to vector<8x128xi32>
    %29 = arith.cmpi sgt, %8, %28 : vector<8x128xi32>
    %cst_3 = arith.constant 1.000000e+02 : f32
    %30 = vector.broadcast %cst_3 : f32 to vector<8x128xf32>
    %31 = arith.mulf %30, %25 : vector<8x128xf32>
    %32 = arith.mulf %31, %25 : vector<8x128xf32>
    %33 = arith.mulf %23, %23 : vector<8x128xf32>
    %34 = arith.addf %32, %33 : vector<8x128xf32>
    %cst_4 = arith.constant 0.000000e+00 : f32
    %35 = vector.broadcast %cst_4 : f32 to vector<8x128xf32>
    %36 = arith.select %27, %34, %35 : vector<8x128xi1>, vector<8x128xf32>
    %cst_5 = arith.constant dense<0.000000e+00> : vector<128xf32>
    %37 = vector.multi_reduction <add>, %36, %cst_5 [0] : vector<8x128xf32> to vector<128xf32>
    %38 = vector.shape_cast %37 : vector<128xf32> to vector<1x128xf32>
    %39 = vector.shape_cast %38 : vector<1x128xf32> to vector<1x1x128xf32>
    %c0_6 = arith.constant 0 : index
    %c0_7 = arith.constant 0 : index
    %c0_8 = arith.constant 0 : index
    %40 = vector.load %arg5[%c0_6, %c0_7, %c0_8] : memref<1x1x128xf32, #tpu.memory_space<vmem>>, vector<1x1x128xf32>
    tpu.vector_store %arg5[%c0_6, %c0_7, %c0_8], %39 {strides = array<i32>} : memref<1x1x128xf32, #tpu.memory_space<vmem>>, vector<1x1x128xf32>,
    %c1_i32 = arith.constant 1 : i32
    %41 = tpu.dynamic_rotate %25 by %c1_i32 dim 1 : vector<8x128xf32>, i32 -> vector<8x128xf32>
    %c1_i32_9 = arith.constant 1 : i32
    %42 = tpu.dynamic_rotate %41 by %c1_i32_9 dim 0 : vector<8x128xf32>, i32 -> vector<8x128xf32>
    %c0_i32_10 = arith.constant 0 : i32
    %43 = vector.broadcast %c0_i32_10 : i32 to vector<8x128xi32>
    %44 = arith.cmpi eq, %2, %43 : vector<8x128xi32>
    %c0_i32_11 = arith.constant 0 : i32
    %45 = vector.broadcast %c0_i32_11 : i32 to vector<8x128xi32>
    %46 = arith.cmpi eq, %1, %45 : vector<8x128xi32>
    %47 = vector.broadcast %12 : f32 to vector<8x128xf32>
    %48 = arith.select %46, %47, %42 : vector<8x128xi1>, vector<8x128xf32>
    %49 = arith.select %44, %48, %41 : vector<8x128xi1>, vector<8x128xf32>
    %cst_12 = arith.constant -4.000000e+02 : f32
    %50 = vector.broadcast %cst_12 : f32 to vector<8x128xf32>
    %51 = arith.mulf %50, %0 : vector<8x128xf32>
    %52 = arith.mulf %51, %25 : vector<8x128xf32>
    %cst_13 = arith.constant 2.000000e+00 : f32
    %53 = vector.broadcast %cst_13 : f32 to vector<8x128xf32>
    %54 = arith.mulf %53, %23 : vector<8x128xf32>
    %55 = arith.subf %52, %54 : vector<8x128xf32>
    %cst_14 = arith.constant 0.000000e+00 : f32
    %56 = vector.broadcast %cst_14 : f32 to vector<8x128xf32>
    %57 = arith.select %27, %55, %56 : vector<8x128xi1>, vector<8x128xf32>
    %cst_15 = arith.constant 2.000000e+02 : f32
    %58 = vector.broadcast %cst_15 : f32 to vector<8x128xf32>
    %59 = arith.mulf %58, %49 : vector<8x128xf32>
    %cst_16 = arith.constant 0.000000e+00 : f32
    %60 = vector.broadcast %cst_16 : f32 to vector<8x128xf32>
    %61 = arith.select %29, %59, %60 : vector<8x128xi1>, vector<8x128xf32>
    %62 = arith.addf %57, %61 : vector<8x128xf32>
    %c0_17 = arith.constant 0 : index
    %c0_18 = arith.constant 0 : index
    %63 = vector.load %arg4[%c0_17, %c0_18] : memref<8x128xf32, #tpu.memory_space<vmem>>, vector<8x128xf32>
    tpu.vector_store %arg4[%c0_17, %c0_18], %62 {strides = array<i32>} : memref<8x128xf32, #tpu.memory_space<vmem>>, vector<8x128xf32>,
    return
  }
  func.func @transform_0(%arg0: i32) -> i32 {
    %c0_i32 = arith.constant 0 : i32
    %c0_i32_0 = arith.constant 0 : i32
    return %c0_i32 : i32
  }
  func.func @transform_1(%arg0: i32) -> i32 {
    %c0_i32 = arith.constant 0 : i32
    %c0_i32_0 = arith.constant 0 : i32
    return %c0_i32 : i32
  }
  func.func @transform_2(%arg0: i32) -> (i32, i32) {
    %c0_i32 = arith.constant 0 : i32
    %c0_i32_0 = arith.constant 0 : i32
    return %arg0, %c0_i32 : i32, i32
  }
  func.func @transform_3(%arg0: i32) -> (i32, i32) {
    %c0_i32 = arith.constant 0 : i32
    %c0_i32_0 = arith.constant 0 : i32
    return %arg0, %c0_i32 : i32, i32
  }
  func.func @transform_4(%arg0: i32) -> (i32, i32, i32) {
    %c0_i32 = arith.constant 0 : i32
    %c0_i32_0 = arith.constant 0 : i32
    %c0_i32_1 = arith.constant 0 : i32
    return %arg0, %c0_i32, %c0_i32_0 : i32, i32, i32
  }
}

</mosaic_0001>

<bundles_post_ra>
// kernel: cutest_forward.1
= control target key start
LH: loop header
LB: loop body
LE: loop exit
PB: predicated region body
PF: predicated region fallthrough
CT: control target
= control target key end

     0   :  { %10 = vsyncpa [#allocation4], 0  ;;  %s742_s0 = inlined_call_operand.vmem [shape: f32[2], index: 0, kind: input, shape index: {}]   ;;  %s743_s1 = inlined_call_operand.vmem [shape: f32[2], index: 1, kind: input, shape index: {}]   ;;  %s744_s2 = inlined_call_operand.vmem [shape: f32[16,128], index: 2, kind: input, shape index: {}]   ;;  %s745_s3 = inlined_call_operand.hbm [shape: f32[16,128], index: 3, kind: output, shape index: {0}]   ;;  %s746_s4 = inlined_call_operand.vmem [shape: f32[2,1,128], index: 4, kind: output, shape index: {1}]  }
   0x1   :  { %11 = vsyncpa [#allocation6], 0 }
   0x2   :  { %12 = vsyncpa [#allocation3], 0 }
   0x3   :  { %14 = vsyncpa [#allocation3 + $0x1], 0  ;;  %s610_s15 = smov 0   ;;  %s612_s16 = smov 0  }
   0x4   :  { %s614_s17 = smov 0   ;;  %s616_s18 = smov 0  }
   0x5 LB: > { %s631_s19 = sadd.s32 4294967295, %s578_s18   ;;  %s403_s20 = sadd.s32 4294967294, %s578_s18   ;;  %s578_s18 = sphi %s616_s18, %s764_s18   ;;  %s574_s17 = sphi %s614_s17, %s763_s17   ;;  %s570_s16 = sphi %s612_s16, %s762_s16   ;;  %s566_s15 = sphi %s610_s15, %s761_s15  }
   0x6   : > { %s635_s21 = sadd.s32 1, %s578_s18   ;;  %s95_s22 = sadd.s32 1, %s574_s17 }
   0x7   : > { %s92_s23 = ssub.s32 %s578_s18, %s635_s21  ;;  %p105_p0 = scmp.ne.s32.totalorder %s574_s17, %s570_s16 }
   0x8   : > { %p93_p1 = scmp.eq.s32.totalorder %s92_s23, 0  ;;  %p106_p2 = scmp.eq.s32.totalorder %s631_s19, 1 }
   0x9   : > { %p111_p3 = scmp.ne.s32.totalorder %s570_s16, %s566_s15  ;;  %p112_p4 = scmp.eq.s32.totalorder %s403_s20, 1 }
   0xa   : > { %s646_s24 = scalar_select %p93_p1, %s574_s17, %s95_s22  }
   0xb   : > { %p648_p5 = por %p106_p2, %p105_p0  ;;  %p652_p6 = por %p112_p4, %p111_p3 }
   0xc   : > { %p404_p7 = scmp.ge.s32.totalorder %s578_s18, 1  ;;  %p145_p8 = scmp.lt.s32.totalorder %s578_s18, 3 }
   0xd   : > { %s750_s25 = scalar_select %p648_p5, 1, 0 }
   0xe   : > { %s751_s26 = scalar_select %p652_p6, 1, 0 }
   0xf   : > { %p747_p9 = scmp.eq.s32.totalorder %s631_s19, 0  ;;  %p659_p10 = pnand %p404_p7, %p145_p8 }
  0x10   : > { %s158_s30 = sshll.u32 %s742_s0, 4  ;;  %s169_s7 = sshll.u32 %s743_s1, 4  ;;  %s159_s30 = int_to_ptr.vmem [resolvable:$true] %s158_s30  ;;  %s170_s7 = int_to_ptr.vmem [resolvable:$true] %s169_s7 }
  0x11   : > { %s752_s27 = scalar_select %p659_p10, 1, 0 }
  0x12   : > { %p428_p11 = pneg %p659_p10  ;;  %s480_s9 = scalar_lea.vmem %s159_s30, 16 }
  0x13   : > { %p481_p13 = scmp.ne.s32.totalorder %s159_s30, %s480_s9  ;;  %p488_p3 = scmp.lt.s32.totalorder %s159_s30, %s159_s30 }
  0x14   : > { %p673_p12 = pnand %p747_p9, %p428_p11  ;;  %p489_p4 = scmp.lt.s32.totalorder %s480_s9, %s480_s9 }
  0x16   : > { %p482_p0 = pneg %p673_p12  ;;  %p490_p7 = por %p489_p4, %p488_p3 }
  0x18   : > { %p483_p1 = pnand %p482_p0, %p481_p13 }
  0x1a   : > { %p484_p2 = pneg %p483_p1 }
  0x1c   : > { %p491_p8 = pnand %p490_p7, %p484_p2 }
  0x1e   : > { %494 = shalt.err (!%p491_p8)
}
  0x1f   : > { %s580_s10 = smov [#allocation2]   ;;  %s495_s11 = scalar_lea.vmem %s170_s7, 16 }
  0x20   : > { %431 = dma.vmem_to_smem (!%p673_p12), %s159_s30, 16, %s580_s10, [#allocation4]  }
  0x21   : > { %p496_p11 = scmp.ne.s32.totalorder %s170_s7, %s495_s11  ;;  %p503_p5 = scmp.lt.s32.totalorder %s170_s7, %s170_s7 }
  0x22   : > { %p504_p10 = scmp.lt.s32.totalorder %s495_s11, %s495_s11 }
  0x23   : > { %p498_p9 = pnand %p496_p11, %p482_p0 }
  0x24   : > { %p505_p13 = por %p504_p10, %p503_p5 }
  0x25   : > { %p499_p6 = pneg %p498_p9 }
  0x27   : > { %p506_p1 = pnand %p505_p13, %p499_p6 }
  0x29   : > { %509 = shalt.err (!%p506_p1)
}
  0x2a   : > { %s581_s12 = smov [#allocation5]   ;;  %p754_p2 = scmp.ne.s32.totalorder %s752_s27, 0 }
  0x2b   : > { %434 = dma.vmem_to_smem (!%p673_p12), %s170_s7, 16, %s581_s12, [#allocation6]  }
  0x2c   : > { %189 = sbr.rel (%p754_p2) target bundleno = 321 (0x141), region = 32  ;;  %p755_p3 = scmp.eq.s32.totalorder (!%p754_p2), %s631_s19, 0 }
  0x31   : > { %553 = dma.done.wait (%p755_p3), [#allocation4], 16   ;;  %p756_p4 = pmov %p755_p3 }
  0x32   : > { %p757_p9 = pmov %p755_p3 }
  0x33   : > { %555 = vsyncadd (%p756_p4), [#allocation4], 4294967280 }
  0x34   : > { %557 = dma.done.wait (%p757_p9), [#allocation6], 16   ;;  %p758_p5 = pmov %p755_p3 }
  0x36   : > { %559 = vsyncadd (%p758_p5), [#allocation6], 4294967280 }
  0x37   : > { %199 = sfence }
  0x38   : > { %p222_p6 = scmp.lt.s32.totalorder %s631_s19, 1  ;;  %s582_s27 = smov 127   ;;  %v230_v1 = vlaneseq }
  0x39   : > { %s413_s28 = sshll.u32 %s631_s19, 3  ;;  %s239_s29 = sld [smem:[#allocation2 + %s631_s19]] }
  0x3a   : > { %s695_s13 = scalar_select %p222_p6, %s631_s19, 1  ;;  %v235_v2 = vstv %s413_s28  ;;  %v231_v3 = vshrl.u32 %v230_v1, 7  ;;  %v233_v5 = vand.u32 127, %v230_v1 }
  0x3b   : > { %s583_s30 = smov 1   ;;  %s240_s8 = sld [smem:[#allocation5 + %s631_s19]] }
  0x3c   : > { %s412_s14 = sshll.u32 %s695_s13, 3  ;;  %v236_v4 = vadd.s32 %v235_v2, %v231_v3  ;;  %vm245_vm0 = vcmp.eq.s32.totalorder %v231_v3, 7  ;;  %vm244_vm1 = vcmp.eq.s32.totalorder %v233_v5, 127  ;;  %s228_s7 = scalar_lea.vmem %s746_s4, %s695_s13  ;;  %vm270_vm3 = vcmp.eq.s32.totalorder %v231_v3, 0 }
  0x3d   : > { %s225_s23 = scalar_lea.vmem %s744_s2, %s412_s14  ;;  %s214_s9 = sand.u32 1, %s570_s16   ;;  %vm269_vm4 = vcmp.eq.s32.totalorder %v233_v5, 0 }
  0x3e   : > { %v229_v0 = vld [vmem:[%s225_s23] sm:$0xff]  ;;  %v237_v8 = vmul.u32 128, %v236_v4  ;;  %s411_s10 = sshll.u32 %s214_s9, 3  ;;  %s415_s11 = sshll.u32 %s631_s19, 7 }
  0x3f   : > { %241 = vrot.lane.b32.xlu0 %v229_v0, %s582_s27  ;;  %v246_v6 = vstv %s239_s29  ;;  %v249_v9 = vsub.f32 1.0, %v229_v0  ;;  %v250_v11 = vmul.f32 %v229_v0, %v229_v0  ;;  %v274_v12 = vmul.f32 -400.0, %v229_v0  ;;  %s216_s12 = scalar_lea.vmem [#allocation7], %s411_s10  ;;  %s298_s22 = scalar_lea.hbm %s745_s3, %s415_s11 }
  0x40   : > { %v238_v15 = vadd.s32 %v237_v8, %v233_v5  ;;  %s300_s14 = sshll.u32 %s216_s12, 4  ;;  %s284_s23 = scalar_lea.sflag [#allocation3], %s214_s9  ;;  %s301_s14 = int_to_ptr.vmem [resolvable:$true] %s300_s14 }
  0x41   : > { %v276_v16 = vmul.f32 2.0, %v249_v9  ;;  %v256_v18 = vmul.f32 %v249_v9, %v249_v9  ;;  %v271_v32 = vstv %s240_s8  ;;  %s510_s27 = scalar_lea.vmem %s301_s14, 128  ;;  %p759_p12 = scmp.ne.s32.totalorder %s750_s25, 0 }
  0x42   : > { %vm252_vm2 = vcmp.lt.s32.totalorder %v238_v15, 2047  ;;  %vm253_vm5 = vcmp.gt.s32.totalorder %v238_v15, 0  ;;  %p511_p10 = scmp.ne.s32.totalorder %s301_s14, %s510_s27  ;;  %s584_s28 = smov [#allocation7]  }
  0x43   : > { %s514_s29 = sshll.u32 %s584_s28, 4  ;;  %s515_s29 = int_to_ptr.vmem [resolvable:$false] %s514_s29 }
  0x44   : > { %p512_p0 = pnand %p511_p10, %p759_p12  ;;  %s516_s19 = scalar_lea.vmem %s515_s29, 256 }
  0x45   : > { %p517_p8 = scmp.lt.s32.totalorder %s301_s14, %s515_s29  ;;  %p518_p11 = scmp.lt.s32.totalorder %s516_s19, %s510_s27 }
  0x46   : > { %p513_p7 = pneg %p512_p0 }
  0x47   : > { %p519_p13 = por %p518_p11, %p517_p8 }
  0x49   : > { %p520_p1 = pnand %p519_p13, %p513_p7 }
  0xb1   : > { %v242_v7 = vpop.permute.xlu0 %241 }
  0xb2   : > { %v243_v10 = vrot.slane %v242_v7, 1 }
  0xb4   : > { %v247_v13 = vsel %vm245_vm0, %v246_v6, %v243_v10 }
  0xb5   : > { %v248_v14 = vsel %vm244_vm1, %v247_v13, %v242_v7 }
  0xb6   : > { %v251_v17 = vsub.f32 %v248_v14, %v250_v11 }
  0xb8   : > { %v254_v19 = vmul.f32 100.0, %v251_v17  ;;  %266 = vrot.lane.b32.xlu0 %v251_v17, %s583_s30  ;;  %v275_v20 = vmul.f32 %v274_v12, %v251_v17 }
  0xba   : > { %v255_v21 = vmul.f32 %v254_v19, %v251_v17  ;;  %v277_v22 = vsub.f32 %v275_v20, %v276_v16 }
  0xbc   : > { %v257_v23 = vadd.f32 %v256_v18, %v255_v21  ;;  %v278_v24 = vsel %vm252_vm2, %v277_v22, 0.0 }
  0xbe   : > { %v258_v25 = vsel %vm252_vm2, %v257_v23, 0.0 }
  0xbf   : > { %v259_v26 = vrot.slane %v258_v25, 4 }
  0xc1   : > { %v260_v27 = vadd.f32 %v259_v26, %v258_v25 }
  0xc3   : > { %v261_v28 = vrot.slane %v260_v27, 2 }
  0xc5   : > { %v262_v29 = vadd.f32 %v261_v28, %v260_v27 }
  0xc7   : > { %v263_v30 = vrot.slane %v262_v29, 1 }
  0xc9   : > { %v264_v31 = vadd.f32 %v263_v30, %v262_v29 }
  0xcb   : > { %265 = vst [vmem:[%s228_s7] sm:$0x1] %v264_v31 }
 0x12a   : > { %v267_v33 = vpop.permute.xlu0 %266 }
 0x12b   : > { %v268_v34 = vrot.slane %v267_v33, 7 }
 0x12d   : > { %v272_v35 = vsel %vm270_vm3, %v271_v32, %v268_v34 }
 0x12e   : > { %v273_v36 = vsel %vm269_vm4, %v272_v35, %v267_v33 }
 0x12f   : > { %v279_v37 = vmul.f32 200.0, %v273_v36 }
 0x131   : > { %v280_v38 = vsel %vm253_vm5, %v279_v37, 0.0 }
 0x132   : > { %v281_v39 = vadd.f32 %v280_v38, %v278_v24 }
 0x134   : > { %282 = vst [vmem:[%s216_s12] sm:$0xff] %v281_v39 }
 0x135   : > { %523 = shalt.err (!%p520_p1)
}
 0x136   : > { %s524_s30 = scalar_lea.hbm %s298_s22, 128  ;;  %s528_s7 = scalar_lea.hbm %s745_s3, 256 }
 0x137   : > { %p525_p2 = scmp.ne.s32.totalorder %s298_s22, %s524_s30  ;;  %p529_p9 = scmp.lt.s32.totalorder %s298_s22, %s745_s3 }
 0x138   : > { %p530_p5 = scmp.lt.s32.totalorder %s528_s7, %s524_s30 }
 0x139   : > { %p526_p3 = pnand %p525_p2, %p759_p12 }
 0x13a   : > { %p531_p6 = por %p530_p5, %p529_p9 }
 0x13b   : > { %p527_p4 = pneg %p526_p3 }
 0x13d   : > { %p532_p10 = pnand %p531_p6, %p527_p4 }
 0x13f   : > { %535 = shalt.err (!%p532_p10)
}
 0x140   : > { %426 = dma.vmem_to_hbm [thread:$0]  (%p759_p12), %s301_s14, 128, %s298_s22, %s284_s23  }
 0x141 PF: > { %p443_p0 = scmp.ge.s32.totalorder %s578_s18, 2  ;;  %s315_s10 = sand.u32 1, %s566_s15  }
 0x142   : > { %p760_p7 = scmp.ne.s32.totalorder %s751_s26, 0  ;;  %s316_s11 = scalar_lea.sflag [#allocation3], %s315_s10 }
 0x144   : > { %p436_p8 = pnand %p443_p0, %p760_p7 }
 0x146   : > { %p437_p11 = pneg %p436_p8 }
 0x148   : > { %561 = dma.done.wait (%p437_p11), %s316_s11, 128  }
 0x149   : > { %563 = vsyncadd (%p437_p11), %s316_s11, 4294967168  ;;  %p17_p13 = scmp.ge.s32.totalorder %s635_s21, 4   ;;  %s761_s15 = smov %s570_s16 }
 0x14a   : > { %s762_s16 = smov %s574_s17  ;;  %s763_s17 = smov %s646_s24 }
 0x14b   : > { %s764_s18 = smov %s635_s21  ;;  %19 = sbr.rel (!%p17_p13) target bundleno = 5 (0x5), region = 88 }
 0x150   :  { %327 = vsyncpa [#allocation3], 1 }
 0x151   :  { %329 = vsyncpa [#allocation3 + $0x1], 1 }
 0x152   :  { %330 = vsyncpa [#allocation4], 1 }
 0x153   :  { %332 = vsyncpa [#allocation4 + $0x1], 1 }
 0x154   :  { %333 = vsyncpa [#allocation6], 1 }

</bundles_post_ra>
